<compile_context>
chip_gen: v7x
topology: tpu7x:2x2x1
jax: 0.10.0
libtpu: 0.0.40
codegen_flags: <defaults>
</compile_context>

<pallas_src>
import jax
import jax.numpy as jnp
from jax.experimental import pallas as pl
from jax.experimental.pallas import tpu as pltpu  # noqa: F401  (kept for TPU-specific tuning hooks)


def _pos_embed_kernel(tab_ref, sel_ref, out_ref):
    """Single-shot kernel.

    tab_ref: (2F, W+H)  block-diagonal packed table:
               rows [0,F)  hold col_embed.T in columns [0,W), zeros elsewhere
               rows [F,2F) hold row_embed.T in columns [W,W+H), zeros elsewhere
    sel_ref: (W+H, H*W) constant 0/1 selection matrix:
               sel[j,     i*W+j] = 1   (x / column embedding placement)
               sel[W+i,   i*W+j] = 1   (y / row    embedding placement)
    out_ref: (2F, H*W)  NCHW-flattened position embedding.
    """
    # One MXU matmul builds the whole tile; one full-vreg lane-dense store.
    out_ref[...] = jnp.dot(tab_ref[...], sel_ref[...],
                           preferred_element_type=jnp.float32)


def position_embedding_learned(x, row_embed_w, col_embed_w):
    """Mirror of PositionEmbeddingLearned.forward.

    x:            (B, C, H, W)  -- only its shape is used (like in PyTorch)
    row_embed_w:  (H_res, F)    -- row embedding table
    col_embed_w:  (W_res, F)    -- col embedding table
    returns:      (B, 2*F, H, W) float32 (NCHW, same as PyTorch)
    """
    b = x.shape[0]
    h, w = x.shape[-2], x.shape[-1]
    f = row_embed_w.shape[1]
    assert row_embed_w.shape[0] >= h and col_embed_w.shape[0] >= w

    # Embedding lookup on arange == slicing the tables; pre-transpose so channels land
    # on sublanes and spatial on lanes (tiny arrays; pure wrapper-side layout plumbing).
    col_t = col_embed_w[:w].astype(jnp.float32).T  # (F, W)
    row_t = row_embed_w[:h].astype(jnp.float32).T  # (F, H)

    # Block-diagonal packed table (2F, W+H): one input DMA instead of two narrow ones.
    packed = jnp.concatenate(
        [jnp.concatenate([col_t, jnp.zeros((f, h), jnp.float32)], axis=1),
         jnp.concatenate([jnp.zeros((f, w), jnp.float32), row_t], axis=1)],
        axis=0)                                                     # (2F, W+H)

    # Constant selection matrix (W+H, H*W), built once in the wrapper (XLA const-folds).
    k = jnp.arange(h * w)                                            # flat index i*W + j
    sel_col = (jnp.arange(w)[:, None] == (k % w)[None, :]).astype(jnp.float32)   # (W, H*W)
    sel_row = (jnp.arange(h)[:, None] == (k // w)[None, :]).astype(jnp.float32)  # (H, H*W)
    sel = jnp.concatenate([sel_col, sel_row], axis=0)                # (W+H, H*W)

    flops = 2 * (2 * f) * (w + h) * (h * w)
    bytes_accessed = 4 * ((2 * f) * (w + h) + (w + h) * (h * w) + (2 * f) * (h * w))

    pos_flat = pl.pallas_call(
        _pos_embed_kernel,
        out_shape=jax.ShapeDtypeStruct((2 * f, h * w), jnp.float32),
        cost_estimate=pl.CostEstimate(flops=flops, transcendentals=0,
                                      bytes_accessed=bytes_accessed),
    )(packed, sel)

    # (2F, H*W) -> (1, 2F, H, W): contiguous reshape (free).  Batch replication is a
    # broadcast in the wrapper (identical to the PyTorch `.repeat(B,1,1,1)` values);
    # XLA fuses it into the consumer instead of writing B copies to HBM here.
    return jnp.broadcast_to(pos_flat.reshape(1, 2 * f, h, w), (b, 2 * f, h, w))


def _reference(x, row_embed_w, col_embed_w):
    """Pure-JAX reference identical to the PyTorch forward."""
    b = x.shape[0]
    h, w = x.shape[-2], x.shape[-1]
    x_emb = col_embed_w[:w]  # (W, F)
    y_emb = row_embed_w[:h]  # (H, F)
    pos = jnp.concatenate(
        [jnp.broadcast_to(x_emb[None, :, :], (h, w, x_emb.shape[-1])),
         jnp.broadcast_to(y_emb[:, None, :], (h, w, y_emb.shape[-1]))],
        axis=-1)                                   # (H, W, 2F)
    pos = jnp.transpose(pos, (2, 0, 1))            # (2F, H, W)
    return jnp.broadcast_to(pos[None], (b,) + pos.shape)


if __name__ == "__main__":
    # Module config: res=(16, 16), num_pos_feats=64  -> per-table feat dim F=32
    H_RES, W_RES = 16, 16
    NUM_POS_FEATS = 64
    F = NUM_POS_FEATS // 2

    key = jax.random.PRNGKey(0)
    k_row, k_col, k_x = jax.random.split(key, 3)
    # nn.init.uniform_ default is U(0, 1)
    row_embed_w = jax.random.uniform(k_row, (H_RES, F), dtype=jnp.float32)
    col_embed_w = jax.random.uniform(k_col, (W_RES, F), dtype=jnp.float32)

    # Input only contributes its shape (B, C, H, W), exactly as in PyTorch.
    x = jax.random.normal(k_x, (2, 4, 16, 16), dtype=jnp.float32)

    pos = position_embedding_learned(x, row_embed_w, col_embed_w)
    pos = jax.block_until_ready(pos)

    ref = _reference(x, row_embed_w, col_embed_w)
    assert pos.shape == (2, NUM_POS_FEATS, 16, 16), pos.shape
    assert jnp.allclose(pos, ref), "mismatch vs reference"

    print("KERNEL_OK")
</pallas_src>

<mosaic_0001>
module attributes {stable_mosaic.version = 11 : i64} {
  func.func @_pos_embed_kernel(%arg0: memref<64x32xf32, #tpu.memory_space<vmem>>, %arg1: memref<32x256xf32, #tpu.memory_space<vmem>>, %arg2: memref<64x256xf32, #tpu.memory_space<vmem>>) attributes {dimension_semantics = [], scalar_prefetch = 0 : i64, scratch_operands = 0 : i64, tpu.core_type = #tpu.core_type<tc>} {
    %c0 = arith.constant 0 : index
    %c0_0 = arith.constant 0 : index
    %0 = vector.load %arg0[%c0, %c0_0] : memref<64x32xf32, #tpu.memory_space<vmem>>, vector<64x32xf32>
    %c0_1 = arith.constant 0 : index
    %c0_2 = arith.constant 0 : index
    %1 = vector.load %arg1[%c0_1, %c0_2] : memref<32x256xf32, #tpu.memory_space<vmem>>, vector<32x256xf32>
    %cst = arith.constant dense<0.000000e+00> : vector<64x256xf32>
    %2 = tpu.matmul %0, %1, %cst {dimension_numbers = #tpu.dot_dimension_numbers<[1], [0], [0], [1], [0, 0, 1, 1], [], []>} : vector<64x32xf32>, vector<32x256xf32>, vector<64x256xf32> -> vector<64x256xf32>
    %c0_3 = arith.constant 0 : index
    %c0_4 = arith.constant 0 : index
    %3 = vector.load %arg2[%c0_3, %c0_4] : memref<64x256xf32, #tpu.memory_space<vmem>>, vector<64x256xf32>
    tpu.vector_store %arg2[%c0_3, %c0_4], %2 {strides = array<i32>} : memref<64x256xf32, #tpu.memory_space<vmem>>, vector<64x256xf32>,
    return
  }
}

</mosaic_0001>

<bundles_post_ra>
// kernel: tpu_custom_call.1
= control target key start
LH: loop header
LB: loop body
LE: loop exit
PB: predicated region body
PF: predicated region fallthrough
CT: control target
= control target key end

     0   :  { %v246_v7 = vmov 0.0   ;;  %s333_s0 = inlined_call_operand.vmem [shape: f32[64,32], index: 0, kind: input, shape index: {}]   ;;  %s334_s1 = inlined_call_operand.vmem [shape: f32[32,256], index: 1, kind: input, shape index: {}]   ;;  %s335_s2 = inlined_call_operand.hbm [shape: f32[64,256], index: 2, kind: output, shape index: {}]  }
   0x1   :  { %v21_v0 = vld [vmem:[%s334_s1 + $0x8] sm:$0xff]  ;;  %v23_v1 = vld [vmem:[%s334_s1 + $0x18] sm:$0xff]  ;;  %v20_v2 = vld [vmem:[%s334_s1] sm:$0xff]  ;;  %117 = vmatprep.mubr.f32.mxu0 %v246_v7  ;;  %141 = vmatprep.mubr.f32.mxu1 %v246_v7 }
   0x2   :  { %v206_v3 = vpack.c.bf16 %v23_v1, %v21_v0  ;;  %v22_v4 = vld [vmem:[%s334_s1 + $0x10] sm:$0xff]  ;;  %v25_v5 = vld [vmem:[%s334_s1 + $0x28] sm:$0xff]  ;;  %v27_v6 = vld [vmem:[%s334_s1 + $0x38] sm:$0xff] }
   0x3   :  { %v208_v8 = vpack.c.bf16 %v22_v4, %v20_v2  ;;  %v210_v9 = vpack.c.bf16 %v27_v6, %v25_v5  ;;  %v24_v10 = vld [vmem:[%s334_s1 + $0x20] sm:$0xff]  ;;  %v26_v11 = vld [vmem:[%s334_s1 + $0x30] sm:$0xff] }
   0x4   :  { %207 = vmatprep.subr.bf16.mxu0 %v206_v3  ;;  %214 = vmatprep.subr.bf16.mxu1 %v206_v3  ;;  %v212_v12 = vpack.c.bf16 %v26_v11, %v24_v10 }
   0x5   :  { %209 = vmatpush1.bf16.msra.mxu0 %v208_v8  ;;  %216 = vmatpush1.bf16.msra.mxu1 %v208_v8 }
   0x6   :  { %211 = vmatprep.subr.bf16.mxu0 %v210_v9  ;;  %215 = vmatprep.subr.bf16.mxu1 %v210_v9 }
   0x7   :  { %7 = vsyncpa [#allocation3], 0  ;;  %v12_v13 = vld [vmem:[%s333_s0] sm:$0xff]  ;;  %vm28_vm0 = vcmask 261120   ;;  %v13_v15 = vld [vmem:[%s333_s0 + $0x8] sm:$0xff] }
   0x8   :  { %v16_v14 = vld [vmem:[%s333_s0 + $0x20] sm:$0xff]  ;;  %v17_v16 = vld [vmem:[%s333_s0 + $0x28] sm:$0xff]  ;;  %v14_v17 = vld [vmem:[%s333_s0 + $0x10] sm:$0xff] }
   0x9   :  { %213 = vmatpush1.bf16.msra.mxu0 %v212_v12  ;;  %217 = vmatpush1.bf16.msra.mxu1 %v212_v12  ;;  %v18_v18 = vld [vmem:[%s333_s0 + $0x30] sm:$0xff]  ;;  %v15_v19 = vld [vmem:[%s333_s0 + $0x18] sm:$0xff] }
   0xa   :  { %v19_v20 = vld [vmem:[%s333_s0 + $0x38] sm:$0xff]  ;;  %s247_s0 = smov [#allocation2]  }
   0xb   :  { %s187_s12 = sshll.u32 %s247_s0, 4  ;;  %s188_s12 = int_to_ptr.vmem [resolvable:$true] %s187_s12 }
   0xc   :  { %198 = vmatmul.mubr.msk.f32.vlgmr.msra.gmra.mrb[0].mxu0 %vm28_vm0, %v12_v13  ;;  %202 = vmatmul.mubr.msk.f32.vlgmr.msra.gmra.mrb[0].mxu1 %vm28_vm0, %v16_v14  ;;  %s222_s13 = scalar_lea.vmem %s188_s12, 2048  ;;  %p227_p1 = scmp.lt.s32.totalorder %s188_s12, %s188_s12 }
   0xd   :  { %123 = vmatprep.mubr.f32.mxu0 %v246_v7  ;;  %147 = vmatprep.mubr.f32.mxu1 %v246_v7  ;;  %p223_p0 = scmp.ne.s32.totalorder %s188_s12, %s222_s13  ;;  %p228_p2 = scmp.lt.s32.totalorder %s222_s13, %s222_s13 }
   0xf   :  { %p229_p3 = por %p228_p2, %p227_p1 }
  0x10   :  { %199 = vmatmul.mubr.msk.f32.gmra.mrb[2].mxu0 %vm28_vm0, %v13_v15  ;;  %203 = vmatmul.mubr.msk.f32.gmra.mrb[2].mxu1 %vm28_vm0, %v17_v16 }
  0x11   :  { %129 = vmatprep.mubr.f32.mxu0 %v246_v7  ;;  %153 = vmatprep.mubr.f32.mxu1 %v246_v7  ;;  %p230_p4 = pnand %p229_p3, %p223_p0 }
  0x14   :  { %200 = vmatmul.mubr.msk.f32.gmra.mrb[4].mxu0 %vm28_vm0, %v14_v17  ;;  %204 = vmatmul.mubr.msk.f32.gmra.mrb[4].mxu1 %vm28_vm0, %v18_v18 }
  0x15   :  { %135 = vmatprep.mubr.f32.mxu0 %v246_v7  ;;  %159 = vmatprep.mubr.f32.mxu1 %v246_v7 }
  0x18   :  { %201 = vmatmul.mubr.msk.f32.gmra.mrb[6].mxu0 %vm28_vm0, %v15_v19  ;;  %205 = vmatmul.mubr.msk.f32.gmra.mrb[6].mxu1 %vm28_vm0, %v19_v20 }
  0xdf   :  { %v119_v21 = vpop.f32.mrb[0].mxu0  ;;  %v143_v22 = vpop.f32.mrb[0].mxu1 }
  0xe0   :  { %166 = vst [vmem:[#allocation2] sm:$0xff] %v119_v21  ;;  %174 = vst [vmem:[#allocation2 + $0x40] sm:$0xff] %v143_v22  ;;  %v121_v23 = vpop.f32.mrb[1].mxu0  ;;  %v145_v24 = vpop.f32.mrb[1].mxu1 }
  0xe1   :  { %167 = vst [vmem:[#allocation2 + $0x8] sm:$0xff] %v121_v23  ;;  %175 = vst [vmem:[#allocation2 + $0x48] sm:$0xff] %v145_v24 }
  0xe3   :  { %v125_v25 = vpop.f32.mrb[2].mxu0  ;;  %v149_v26 = vpop.f32.mrb[2].mxu1 }
  0xe4   :  { %168 = vst [vmem:[#allocation2 + $0x10] sm:$0xff] %v125_v25  ;;  %176 = vst [vmem:[#allocation2 + $0x50] sm:$0xff] %v149_v26  ;;  %v127_v27 = vpop.f32.mrb[3].mxu0  ;;  %v151_v28 = vpop.f32.mrb[3].mxu1 }
  0xe5   :  { %169 = vst [vmem:[#allocation2 + $0x18] sm:$0xff] %v127_v27  ;;  %177 = vst [vmem:[#allocation2 + $0x58] sm:$0xff] %v151_v28 }
  0xe7   :  { %v131_v29 = vpop.f32.mrb[4].mxu0  ;;  %v155_v30 = vpop.f32.mrb[4].mxu1 }
  0xe8   :  { %170 = vst [vmem:[#allocation2 + $0x20] sm:$0xff] %v131_v29  ;;  %178 = vst [vmem:[#allocation2 + $0x60] sm:$0xff] %v155_v30  ;;  %v133_v31 = vpop.f32.mrb[5].mxu0  ;;  %v157_v32 = vpop.f32.mrb[5].mxu1 }
  0xe9   :  { %171 = vst [vmem:[#allocation2 + $0x28] sm:$0xff] %v133_v31  ;;  %179 = vst [vmem:[#allocation2 + $0x68] sm:$0xff] %v157_v32 }
  0xeb   :  { %v137_v33 = vpop.f32.mrb[6].mxu0  ;;  %v161_v34 = vpop.f32.mrb[6].mxu1 }
  0xec   :  { %172 = vst [vmem:[#allocation2 + $0x30] sm:$0xff] %v137_v33  ;;  %180 = vst [vmem:[#allocation2 + $0x70] sm:$0xff] %v161_v34  ;;  %v139_v35 = vpop.f32.mrb[7].mxu0  ;;  %v163_v36 = vpop.f32.mrb[7].mxu1 }
  0xed   :  { %173 = vst [vmem:[#allocation2 + $0x38] sm:$0xff] %v139_v35  ;;  %181 = vst [vmem:[#allocation2 + $0x78] sm:$0xff] %v163_v36 }
  0xee   :  { %233 = shalt.err (!%p230_p4)
}
  0xef   :  { %s234_s16 = scalar_lea.hbm %s335_s2, 2048 }
  0xf0   :  { %p235_p5 = scmp.ne.s32.totalorder %s335_s2, %s234_s16  ;;  %p238_p6 = scmp.lt.u32.totalorder %s234_s16, %s335_s2 }
  0xf2   :  { %p240_p7 = pnand %p238_p6, %p235_p5 }
  0xf4   :  { %243 = shalt.err (!%p240_p7)
}
  0xf5   :  { %s248_s21 = smov 256   ;;  %s249_s22 = smov 16  }
  0xf6   :  { %193 = dma.vmem_to_hbm [thread:$0]  %s188_s12, 2048, %s335_s2, [#allocation3], %s248_s21, %s248_s21, %s249_s22  }
  0xf7   :  { %244 = dma.done.wait [#allocation3], 2048  }
  0xf8   :  { %245 = vsyncadd [#allocation3], 4294965248 }
  0xf9   :  { %197 = vsyncpa [#allocation3], 1 }

</bundles_post_ra>
